<compile_context>
chip_gen: v6e
topology: v6e:2x2x1
jax: 0.10.0
libtpu: 0.0.40
codegen_flags: <defaults>
</compile_context>

<pallas_src>
import math

import jax
import jax.numpy as jnp
from jax import lax
from jax.experimental import pallas as pl
from jax.experimental.pallas import tpu as pltpu

_LN_EPS = 1e-5  # torch nn.LayerNorm default


def _patch_merging_kernel(x_ref, wa_ref, wb_ref, bias_ref, o_ref):
    # x_ref  : (tr, 2, W2, 2C)   merged-row block; axis 1 = H-row parity.
    #          channel order: parity0 = [x0 | x2], parity1 = [x1 | x3]
    # wa/wb  : (2C, 2C) bf16     gamma-folded reduction weight halves
    # bias   : (1, 2C)  f32      beta @ W
    # o_ref  : (tr*W2, 2C)
    tr, _, w2, c2 = x_ref.shape
    rows = tr * w2
    k = 2.0 * c2                      # LayerNorm width = 4*C

    x = x_ref[...]
    a = x[:, 0].reshape(rows, c2).astype(jnp.float32)   # even-h half [x0|x2]
    b = x[:, 1].reshape(rows, c2).astype(jnp.float32)   # odd-h  half [x1|x3]

    # One-pass LayerNorm statistics over the (virtual) 4C channel axis.
    s1 = jnp.sum(a, axis=-1, keepdims=True) + jnp.sum(b, axis=-1, keepdims=True)
    s2 = (jnp.sum(a * a, axis=-1, keepdims=True)
          + jnp.sum(b * b, axis=-1, keepdims=True))
    mean = s1 * (1.0 / k)
    # clamp: garbage rows of a masked ragged tail block must not yield NaN
    var = jnp.maximum(s2 * (1.0 / k) - mean * mean, 0.0)
    rstd = lax.rsqrt(var + _LN_EPS)   # EUP

    ah = ((a - mean) * rstd).astype(jnp.bfloat16)
    bh = ((b - mean) * rstd).astype(jnp.bfloat16)

    y = jnp.dot(ah, wa_ref[...], preferred_element_type=jnp.float32)
    y = y + jnp.dot(bh, wb_ref[...], preferred_element_type=jnp.float32)
    y = y + bias_ref[...]
    o_ref[...] = y.astype(o_ref.dtype)


def _vmem_budget():
    """(working-set budget, vmem_limit_bytes), generation-aware with fallback."""
    cap = None
    try:
        info = pltpu.get_tpu_info()
        cap = getattr(info, "vmem_capacity_bytes", None)
    except Exception:
        cap = None
    if not cap:
        cap = 64 * 1024 * 1024                  # conservative: v7x per-TC VMEM
    if cap >= 100 * 1024 * 1024:                # v5e / v6e (128 MiB)
        return 80 * 1024 * 1024, 100 * 1024 * 1024
    return 28 * 1024 * 1024, 44 * 1024 * 1024   # v7x (64 MiB), headroom for scratch


def _pick_row_tile(R, W2, C2, in_itemsize, out_itemsize, budget):
    """Merged-row tile size: as large as the VMEM budget allows."""
    # Grid-invariant operands (constant index_map -> fetched once, but the
    # pipeline still allocates double buffers): two bf16 weight halves + bias.
    fixed = 2 * (2 * C2 * C2 * 2) + 2 * (C2 * 4)
    per_row = 2 * (2 * W2 * C2 * in_itemsize)   # input block, double-buffered
    per_row += 2 * (W2 * C2 * out_itemsize)     # output block, double-buffered
    avail = max(budget - fixed, per_row)
    tr = max(1, int(avail // per_row))
    tr = min(tr, R)
    # v7x has two TensorCores: keep >= 2 grid steps so the "parallel" axis can
    # be sharded across them (no-op on 1-TC chips / tiny inputs).
    if R >= 2:
        tr = min(tr, pl.cdiv(R, 2))
    # Sublane-friendly flattened rows: tr*W2 % 8 == 0.  Only round DOWN so the
    # VMEM budget just enforced cannot be exceeded; tr == R (full extent) is
    # always legal regardless of alignment.
    if (tr * W2) % 8 != 0 and tr != R:
        g = 8 // math.gcd(W2, 8)
        if tr >= g:
            tr = (tr // g) * g
        else:
            tr = min(g, R)
    return max(tr, 1)


def patch_merging_pallas(x, H, W, gamma, beta, w_reduction):
    """x: (B, H*W, C). Returns (B, ceil(H/2)*ceil(W/2), 2*C), dtype of x."""
    B, L, C = x.shape
    assert L == H * W, "input feature has wrong size"

    xs = x.reshape(B, H, W, C)
    # matches torch F.pad(x, (0, 0, 0, W % 2, 0, H % 2)); only copies when odd.
    if (H % 2 == 1) or (W % 2 == 1):
        xs = jnp.pad(xs, ((0, 0), (0, H % 2), (0, W % 2), (0, 0)))
    Hp, Wp = xs.shape[1], xs.shape[2]
    H2, W2 = Hp // 2, Wp // 2
    R = B * H2                        # merged-row pairs
    M = R * W2                        # merged tokens
    C2 = 2 * C                        # per-parity channels == output channels

    # Free (no-data-movement) reshape: (B, Hp, Wp, C) -> (R, 2, W2, 2C).
    xs_r = xs.reshape(R, 2, W2, C2)

    # Fold the LayerNorm affine into the reduction weight, permuted to the
    # kernel channel order [x0, x2, x1, x3].
    perm = jnp.concatenate([
        jnp.arange(0 * C, 1 * C), jnp.arange(2 * C, 3 * C),
        jnp.arange(1 * C, 2 * C), jnp.arange(3 * C, 4 * C)])
    w_fold = (gamma[perm][:, None] * w_reduction[perm, :]).astype(jnp.bfloat16)
    wa = w_fold[:C2]                  # rows for the even-h chunk [x0 | x2]
    wb = w_fold[C2:]                  # rows for the odd-h chunk  [x1 | x3]
    bias = (beta @ w_reduction).reshape(1, C2).astype(jnp.float32)

    out_dtype = x.dtype               # dtype-preserving (bf16 in -> bf16 out)
    budget, vmem_limit = _vmem_budget()
    tr = _pick_row_tile(R, W2, C2,
                        in_itemsize=jnp.dtype(x.dtype).itemsize,
                        out_itemsize=jnp.dtype(out_dtype).itemsize,
                        budget=budget)
    grid = (pl.cdiv(R, tr),)

    out = pl.pallas_call(
        _patch_merging_kernel,
        out_shape=jax.ShapeDtypeStruct((M, C2), out_dtype),
        grid_spec=pltpu.PrefetchScalarGridSpec(
            num_scalar_prefetch=0,
            grid=grid,
            in_specs=[
                # one contiguous block per step: both parities of tr merged rows
                pl.BlockSpec((tr, 2, W2, C2), lambda i: (i, 0, 0, 0)),
                pl.BlockSpec((C2, C2), lambda i: (0, 0)),
                pl.BlockSpec((C2, C2), lambda i: (0, 0)),
                pl.BlockSpec((1, C2), lambda i: (0, 0)),
            ],
            out_specs=pl.BlockSpec((tr * W2, C2), lambda i: (i, 0)),
        ),
        compiler_params=pltpu.CompilerParams(
            dimension_semantics=("parallel",),
            vmem_limit_bytes=vmem_limit),
    )(xs_r, wa, wb, bias)

    return out.reshape(B, H2 * W2, C2)


def _reference_jax(x, H, W, gamma, beta, w_reduction):
    B, L, C = x.shape
    xs = x.reshape(B, H, W, C)
    if (H % 2 == 1) or (W % 2 == 1):
        xs = jnp.pad(xs, ((0, 0), (0, H % 2), (0, W % 2), (0, 0)))
    x0 = xs[:, 0::2, 0::2, :]
    x1 = xs[:, 1::2, 0::2, :]
    x2 = xs[:, 0::2, 1::2, :]
    x3 = xs[:, 1::2, 1::2, :]
    xm = jnp.concatenate([x0, x1, x2, x3], axis=-1).reshape(B, -1, 4 * C)
    mean = jnp.mean(xm, axis=-1, keepdims=True)
    var = jnp.mean((xm - mean) ** 2, axis=-1, keepdims=True)
    xn = (xm - mean) / jnp.sqrt(var + _LN_EPS) * gamma + beta
    return xn @ w_reduction


if __name__ == "__main__":
    B, C, Hs, Ws = 2, 4, 16, 16       # dim = 4
    L = Hs * Ws

    key = jax.random.PRNGKey(0)
    kx, kw, kg, kb = jax.random.split(key, 4)

    x = jax.random.normal(kx, (B, L, C), dtype=jnp.float32)
    # deterministic synthetic parameters (not a checkpoint)
    w_reduction = 0.05 * jax.random.normal(kw, (4 * C, 2 * C), dtype=jnp.float32)
    gamma = 1.0 + 0.1 * jax.random.normal(kg, (4 * C,), dtype=jnp.float32)
    beta = 0.1 * jax.random.normal(kb, (4 * C,), dtype=jnp.float32)

    out = patch_merging_pallas(x, Hs, Ws, gamma, beta, w_reduction)
    out = jax.block_until_ready(out)

    ref = _reference_jax(x, Hs, Ws, gamma, beta, w_reduction)
    assert out.shape == (B, (Hs // 2) * (Ws // 2), 2 * C), out.shape
    # bf16 GEMM operands (f32 accumulation) -> slightly looser tolerance
    # against the pure-f32 reference.
    max_err = float(jnp.max(jnp.abs(out - ref)))
    assert max_err < 2e-2, max_err

    print("KERNEL_OK")
</pallas_src>

<mosaic_0001>
module attributes {stable_mosaic.version = 11 : i64} {
  func.func @_patch_merging_kernel(%arg0: i32, %arg1: memref<8x2x8x8xf32, #tpu.memory_space<vmem>>, %arg2: memref<8x8xbf16, #tpu.memory_space<vmem>>, %arg3: memref<8x8xbf16, #tpu.memory_space<vmem>>, %arg4: memref<1x8xf32, #tpu.memory_space<vmem>>, %arg5: memref<64x8xf32, #tpu.memory_space<vmem>>) attributes {dimension_semantics = [#tpu.dimension_semantics<parallel>], iteration_bounds = array<i64: 2>, scalar_prefetch = 0 : i64, scratch_operands = 0 : i64, tpu.core_type = #tpu.core_type<tc>, window_params = [{transform_indices = @transform_0, window_bounds = array<i64: 8, 2, 8, 8>}, {pipeline_mode = #tpu.pipeline_mode<synchronous>, transform_indices = @transform_1, window_bounds = array<i64: 8, 8>}, {pipeline_mode = #tpu.pipeline_mode<synchronous>, transform_indices = @transform_2, window_bounds = array<i64: 8, 8>}, {pipeline_mode = #tpu.pipeline_mode<synchronous>, transform_indices = @transform_3, window_bounds = array<i64: 1, 8>}, {transform_indices = @transform_4, window_bounds = array<i64: 64, 8>}]} {
    %c0 = arith.constant 0 : index
    %c0_0 = arith.constant 0 : index
    %c0_1 = arith.constant 0 : index
    %c0_2 = arith.constant 0 : index
    %0 = vector.load %arg1[%c0, %c0_0, %c0_1, %c0_2] : memref<8x2x8x8xf32, #tpu.memory_space<vmem>>, vector<8x2x8x8xf32>
    %1 = vector.extract_strided_slice %0 {offsets = [0, 0, 0, 0], sizes = [8, 1, 8, 8], strides = [1, 1, 1, 1]} : vector<8x2x8x8xf32> to vector<8x1x8x8xf32>
    %2 = vector.shape_cast %1 : vector<8x1x8x8xf32> to vector<8x8x8xf32>
    %3 = vector.shape_cast %2 : vector<8x8x8xf32> to vector<64x8xf32>
    %4 = vector.extract_strided_slice %0 {offsets = [0, 1, 0, 0], sizes = [8, 1, 8, 8], strides = [1, 1, 1, 1]} : vector<8x2x8x8xf32> to vector<8x1x8x8xf32>
    %5 = vector.shape_cast %4 : vector<8x1x8x8xf32> to vector<8x8x8xf32>
    %6 = vector.shape_cast %5 : vector<8x8x8xf32> to vector<64x8xf32>
    %cst = arith.constant dense<0.000000e+00> : vector<64xf32>
    %7 = vector.multi_reduction <add>, %3, %cst [1] : vector<64x8xf32> to vector<64xf32>
    %8 = vector.shape_cast %7 : vector<64xf32> to vector<64x1xf32>
    %cst_3 = arith.constant dense<0.000000e+00> : vector<64xf32>
    %9 = vector.multi_reduction <add>, %6, %cst_3 [1] : vector<64x8xf32> to vector<64xf32>
    %10 = vector.shape_cast %9 : vector<64xf32> to vector<64x1xf32>
    %11 = arith.addf %8, %10 : vector<64x1xf32>
    %12 = arith.mulf %3, %3 : vector<64x8xf32>
    %cst_4 = arith.constant dense<0.000000e+00> : vector<64xf32>
    %13 = vector.multi_reduction <add>, %12, %cst_4 [1] : vector<64x8xf32> to vector<64xf32>
    %14 = vector.shape_cast %13 : vector<64xf32> to vector<64x1xf32>
    %15 = arith.mulf %6, %6 : vector<64x8xf32>
    %cst_5 = arith.constant dense<0.000000e+00> : vector<64xf32>
    %16 = vector.multi_reduction <add>, %15, %cst_5 [1] : vector<64x8xf32> to vector<64xf32>
    %17 = vector.shape_cast %16 : vector<64xf32> to vector<64x1xf32>
    %18 = arith.addf %14, %17 : vector<64x1xf32>
    %cst_6 = arith.constant 6.250000e-02 : f32
    %19 = vector.broadcast %cst_6 : f32 to vector<64x1xf32>
    %20 = arith.mulf %11, %19 : vector<64x1xf32>
    %cst_7 = arith.constant 6.250000e-02 : f32
    %21 = vector.broadcast %cst_7 : f32 to vector<64x1xf32>
    %22 = arith.mulf %18, %21 : vector<64x1xf32>
    %23 = arith.mulf %20, %20 : vector<64x1xf32>
    %24 = arith.subf %22, %23 : vector<64x1xf32>
    %cst_8 = arith.constant 0.000000e+00 : f32
    %25 = vector.broadcast %cst_8 : f32 to vector<64x1xf32>
    %26 = arith.maximumf %24, %25 : vector<64x1xf32>
    %cst_9 = arith.constant 9.99999974E-6 : f32
    %27 = vector.broadcast %cst_9 : f32 to vector<64x1xf32>
    %28 = arith.addf %26, %27 : vector<64x1xf32>
    %29 = math.rsqrt %28 : vector<64x1xf32>
    %30 = vector.broadcast %20 : vector<64x1xf32> to vector<64x8xf32>
    %31 = arith.subf %3, %30 : vector<64x8xf32>
    %32 = vector.broadcast %29 : vector<64x1xf32> to vector<64x8xf32>
    %33 = arith.mulf %31, %32 : vector<64x8xf32>
    %34 = arith.truncf %33 : vector<64x8xf32> to vector<64x8xbf16>
    %35 = vector.broadcast %20 : vector<64x1xf32> to vector<64x8xf32>
    %36 = arith.subf %6, %35 : vector<64x8xf32>
    %37 = vector.broadcast %29 : vector<64x1xf32> to vector<64x8xf32>
    %38 = arith.mulf %36, %37 : vector<64x8xf32>
    %39 = arith.truncf %38 : vector<64x8xf32> to vector<64x8xbf16>
    %c0_10 = arith.constant 0 : index
    %c0_11 = arith.constant 0 : index
    %40 = vector.load %arg2[%c0_10, %c0_11] : memref<8x8xbf16, #tpu.memory_space<vmem>>, vector<8x8xbf16>
    %cst_12 = arith.constant dense<0.000000e+00> : vector<64x8xf32>
    %41 = tpu.matmul %34, %40, %cst_12 {dimension_numbers = #tpu.dot_dimension_numbers<[1], [0], [0], [1], [0, 0, 1, 1], [], []>} : vector<64x8xbf16>, vector<8x8xbf16>, vector<64x8xf32> -> vector<64x8xf32>
    %c0_13 = arith.constant 0 : index
    %c0_14 = arith.constant 0 : index
    %42 = vector.load %arg3[%c0_13, %c0_14] : memref<8x8xbf16, #tpu.memory_space<vmem>>, vector<8x8xbf16>
    %cst_15 = arith.constant dense<0.000000e+00> : vector<64x8xf32>
    %43 = tpu.matmul %39, %42, %cst_15 {dimension_numbers = #tpu.dot_dimension_numbers<[1], [0], [0], [1], [0, 0, 1, 1], [], []>} : vector<64x8xbf16>, vector<8x8xbf16>, vector<64x8xf32> -> vector<64x8xf32>
    %44 = arith.addf %41, %43 : vector<64x8xf32>
    %c0_16 = arith.constant 0 : index
    %c0_17 = arith.constant 0 : index
    %45 = vector.load %arg4[%c0_16, %c0_17] : memref<1x8xf32, #tpu.memory_space<vmem>>, vector<1x8xf32>
    %46 = vector.broadcast %45 : vector<1x8xf32> to vector<64x8xf32>
    %47 = arith.addf %44, %46 : vector<64x8xf32>
    %c0_18 = arith.constant 0 : index
    %c0_19 = arith.constant 0 : index
    %48 = vector.load %arg5[%c0_18, %c0_19] : memref<64x8xf32, #tpu.memory_space<vmem>>, vector<64x8xf32>
    tpu.vector_store %arg5[%c0_18, %c0_19], %47 {strides = array<i32>} : memref<64x8xf32, #tpu.memory_space<vmem>>, vector<64x8xf32>,
    return
  }
  func.func @transform_0(%arg0: i32) -> (i32, i32, i32, i32) {
    %c0_i32 = arith.constant 0 : i32
    %c0_i32_0 = arith.constant 0 : i32
    %c0_i32_1 = arith.constant 0 : i32
    %c0_i32_2 = arith.constant 0 : i32
    return %arg0, %c0_i32, %c0_i32_0, %c0_i32_1 : i32, i32, i32, i32
  }
  func.func @transform_1(%arg0: i32) -> (i32, i32) {
    %c0_i32 = arith.constant 0 : i32
    %c0_i32_0 = arith.constant 0 : i32
    %c0_i32_1 = arith.constant 0 : i32
    return %c0_i32, %c0_i32_0 : i32, i32
  }
  func.func @transform_2(%arg0: i32) -> (i32, i32) {
    %c0_i32 = arith.constant 0 : i32
    %c0_i32_0 = arith.constant 0 : i32
    %c0_i32_1 = arith.constant 0 : i32
    return %c0_i32, %c0_i32_0 : i32, i32
  }
  func.func @transform_3(%arg0: i32) -> (i32, i32) {
    %c0_i32 = arith.constant 0 : i32
    %c0_i32_0 = arith.constant 0 : i32
    %c0_i32_1 = arith.constant 0 : i32
    return %c0_i32, %c0_i32_0 : i32, i32
  }
  func.func @transform_4(%arg0: i32) -> (i32, i32) {
    %c0_i32 = arith.constant 0 : i32
    %c0_i32_0 = arith.constant 0 : i32
    return %arg0, %c0_i32 : i32, i32
  }
}

</mosaic_0001>

<bundles_post_ra>
// kernel: tpu_custom_call.1
= control target key start
LH: loop header
LB: loop body
LE: loop exit
PB: predicated region body
PF: predicated region fallthrough
CT: control target
= control target key end

     0   :  { %s799_s15 = smov 0   ;;  %s1019_s0 = inlined_call_operand.vmem [shape: f32[16,2,8,8], index: 0, kind: input, shape index: {}]   ;;  %s1020_s1 = inlined_call_operand.vmem [shape: bf16[8,8], index: 1, kind: input, shape index: {}]   ;;  %s1021_s2 = inlined_call_operand.vmem [shape: bf16[8,8], index: 2, kind: input, shape index: {}]   ;;  %s1022_s3 = inlined_call_operand.vmem [shape: f32[1,8], index: 3, kind: input, shape index: {}]   ;;  %s1023_s4 = inlined_call_operand.vmem [shape: f32[128,8], index: 4, kind: output, shape index: {}]  }
   0x1 LB: > { %s688_s16 = sadd.s32 4294967295, %s772_s15   ;;  %p692_p0 = scmp.ge.s32.totalorder %s772_s15, 1  ;;  %s772_s15 = sphi %s799_s15, %s14_s15  }
   0x2   : > { %p164_p1 = scmp.lt.s32.totalorder %s772_s15, 3 }
   0x4   : > { %p165_p2 = pnand %p692_p0, %p164_p1 }
   0x5   : > { %s693_s17 = sshll.u32 (!%p165_p2), %s688_s16, 3 }
   0x6   : > { %168 = sbr.rel (%p165_p2) target bundleno = 447 (0x1bf), region = 36  ;;  %p192_p3 = scmp.lt.s32.totalorder (!%p165_p2), %s693_s17, 15 }
   0xb   : > { %s1025_s17 = smov (!%p192_p3, %s693_s17), 15  ;;  %vm221_vm0 = vcmask 64512   ;;  %vm460_vm1 = vcmask 1043456  }
   0xc   : > { %s709_s18 = sshll.u32 %s1025_s17, 4  ;;  %s697_s26 = sshll.u32 %s1025_s17, 3 }
   0xd   : > { %s813_s21 = scalar_lea.vmem %s1019_s0, %s709_s18  ;;  %s998_s5 = scalar_lea.vmem %s1023_s4, %s697_s26 }
   0xe   : > { %v816_v0 = vld [vmem:[%s813_s21 + $0x8] sm:$0xff]  ;;  %v819_v1 = vld [vmem:[%s813_s21] sm:$0xff]  ;;  %v822_v2 = vld [vmem:[%s813_s21 + $0x18] sm:$0xff] }
   0xf   : > { %v246_v3 = vsel %vm221_vm0, %v816_v0, 0.0  ;;  %v222_v4 = vsel %vm221_vm0, %v819_v1, 0.0  ;;  %v829_v5 = vld [vmem:[%s813_s21 + $0x10] sm:$0xff]  ;;  %v249_v6 = vsel %vm221_vm0, %v822_v2, 0.0  ;;  %v839_v9 = vld [vmem:[%s813_s21 + $0x20] sm:$0xff]  ;;  %v846_v12 = vld [vmem:[%s813_s21 + $0x38] sm:$0xff]  ;;  %v278_v17 = vmul.f32 %v819_v1, %v819_v1 }
  0x10   : > { %247 = vadd.xlane.f32.xlu1 %v246_v3  ;;  %223 = vadd.xlane.f32.xlu0 %v222_v4  ;;  %v225_v7 = vsel %vm221_vm0, %v829_v5, 0.0  ;;  %v836_v8 = vld [vmem:[%s813_s21 + $0x30] sm:$0xff]  ;;  %v228_v11 = vsel %vm221_vm0, %v839_v9, 0.0  ;;  %v849_v13 = vld [vmem:[%s813_s21 + $0x28] sm:$0xff]  ;;  %v255_v14 = vsel %vm221_vm0, %v846_v12, 0.0  ;;  %v279_v16 = vmul.f32 %v829_v5, %v829_v5  ;;  %v883_v33 = vld [vmem:[%s813_s21 + $0x40] sm:$0xff] }
  0x11   : > { %v231_v10 = vsel %vm221_vm0, %v836_v8, 0.0  ;;  %v252_v15 = vsel %vm221_vm0, %v849_v13, 0.0  ;;  %v286_v19 = vsel %vm221_vm0, %v278_v17, 0.0  ;;  %v311_v20 = vmul.f32 %v822_v2, %v822_v2  ;;  %v880_v32 = vld [vmem:[%s813_s21 + $0x50] sm:$0xff]  ;;  %v890_v36 = vld [vmem:[%s813_s21 + $0x58] sm:$0xff]  ;;  %v893_v37 = vld [vmem:[%s813_s21 + $0x48] sm:$0xff] }
  0x12   : > { %v289_v18 = vsel %vm221_vm0, %v279_v16, 0.0  ;;  %v310_v21 = vmul.f32 %v816_v0, %v816_v0  ;;  %v281_v24 = vmul.f32 %v836_v8, %v836_v8  ;;  %v280_v25 = vmul.f32 %v839_v9, %v839_v9  ;;  %v900_v40 = vld [vmem:[%s813_s21 + $0x70] sm:$0xff]  ;;  %v903_v41 = vld [vmem:[%s813_s21 + $0x60] sm:$0xff]  ;;  %v910_v44 = vld [vmem:[%s813_s21 + $0x78] sm:$0xff] }
  0x13   : > { %v321_v22 = vsel %vm221_vm0, %v311_v20, 0.0  ;;  %v313_v28 = vmul.f32 %v846_v12, %v846_v12  ;;  %v312_v29 = vmul.f32 %v849_v13, %v849_v13  ;;  %v237_v34 = vsel %vm221_vm0, %v880_v32, 0.0  ;;  %v913_v45 = vld [vmem:[%s813_s21 + $0x68] sm:$0xff]  ;;  %v447_v3 = vld [vmem:[%s1021_s2] sm:$0xf] }
  0x14   : > { %250 = vadd.xlane.f32.xlu1 %v249_v6  ;;  %226 = vadd.xlane.f32.xlu0 %v225_v7  ;;  %v318_v23 = vsel %vm221_vm0, %v310_v21, 0.0  ;;  %v295_v26 = vsel %vm221_vm0, %v281_v24, 0.0  ;;  %v292_v27 = vsel %vm221_vm0, %v280_v25, 0.0  ;;  %v234_v35 = vsel %vm221_vm0, %v883_v33, 0.0  ;;  %v446_v4 = vld [vmem:[%s1020_s1] sm:$0xf] }
  0x15   : > { %v327_v30 = vsel %vm221_vm0, %v313_v28, 0.0  ;;  %v324_v31 = vsel %vm221_vm0, %v312_v29, 0.0  ;;  %v261_v38 = vsel %vm221_vm0, %v890_v36, 0.0  ;;  %v258_v39 = vsel %vm221_vm0, %v893_v37, 0.0  ;;  %740 = vmatprep.subr.msk.bf16.mxu0 %vm460_vm1, %v447_v3  ;;  %741 = vmatprep.subr.msk.bf16.mxu1 %vm460_vm1, %v446_v4 }
  0x16   : > { %v243_v42 = vsel %vm221_vm0, %v900_v40, 0.0  ;;  %v240_v43 = vsel %vm221_vm0, %v903_v41, 0.0  ;;  %v267_v46 = vsel %vm221_vm0, %v910_v44, 0.0  ;;  %v264_v47 = vsel %vm221_vm0, %v913_v45, 0.0 }
  0x17   : > { %v283_v48 = vmul.f32 %v880_v32, %v880_v32  ;;  %v282_v49 = vmul.f32 %v883_v33, %v883_v33  ;;  %v315_v52 = vmul.f32 %v890_v36, %v890_v36  ;;  %v314_v53 = vmul.f32 %v893_v37, %v893_v37 }
  0x18   : > { %232 = vadd.xlane.f32.xlu1 %v231_v10  ;;  %229 = vadd.xlane.f32.xlu0 %v228_v11  ;;  %v285_v56 = vmul.f32 %v900_v40, %v900_v40  ;;  %v284_v57 = vmul.f32 %v903_v41, %v903_v41  ;;  %v317_v60 = vmul.f32 %v910_v44, %v910_v44  ;;  %v462_v6 = vsel %vm460_vm1, %v447_v3, 0 }
  0x19   : > { %v301_v50 = vsel %vm221_vm0, %v283_v48, 0.0  ;;  %v298_v51 = vsel %vm221_vm0, %v282_v49, 0.0  ;;  %v333_v54 = vsel %vm221_vm0, %v315_v52, 0.0  ;;  %v330_v55 = vsel %vm221_vm0, %v314_v53, 0.0  ;;  %721 = vmatpush3.bf16.msra.mxu0 %v462_v6 }
  0x1a   : > { %v307_v58 = vsel %vm221_vm0, %v285_v56, 0.0  ;;  %v304_v59 = vsel %vm221_vm0, %v284_v57, 0.0  ;;  %v316_v61 = vmul.f32 %v913_v45, %v913_v45  ;;  %v339_v62 = vsel %vm221_vm0, %v317_v60, 0.0 }
  0x1b   : > { %v542_v7 = vsel %vm460_vm1, %v446_v4, 0 }
  0x1c   : > { %256 = vadd.xlane.f32.xlu1 %v255_v14  ;;  %253 = vadd.xlane.f32.xlu0 %v252_v15  ;;  %v336_v63 = vsel %vm221_vm0, %v316_v61, 0.0 }
  0x1d   : > { %731 = vmatpush3.bf16.msra.mxu1 %v542_v7 }
  0x20   : > { %290 = vadd.xlane.f32.xlu1 %v289_v18  ;;  %287 = vadd.xlane.f32.xlu0 %v286_v19 }
  0x24   : > { %322 = vadd.xlane.f32.xlu1 %v321_v22  ;;  %319 = vadd.xlane.f32.xlu0 %v318_v23 }
  0x28   : > { %296 = vadd.xlane.f32.xlu1 %v295_v26  ;;  %293 = vadd.xlane.f32.xlu0 %v292_v27 }
  0x2c   : > { %328 = vadd.xlane.f32.xlu1 %v327_v30  ;;  %325 = vadd.xlane.f32.xlu0 %v324_v31 }
  0x30   : > { %238 = vadd.xlane.f32.xlu1 %v237_v34  ;;  %235 = vadd.xlane.f32.xlu0 %v234_v35 }
  0x34   : > { %262 = vadd.xlane.f32.xlu1 %v261_v38  ;;  %259 = vadd.xlane.f32.xlu0 %v258_v39 }
  0x38   : > { %244 = vadd.xlane.f32.xlu1 %v243_v42  ;;  %241 = vadd.xlane.f32.xlu0 %v240_v43 }
  0x3c   : > { %268 = vadd.xlane.f32.xlu1 %v267_v46  ;;  %265 = vadd.xlane.f32.xlu0 %v264_v47 }
  0x40   : > { %302 = vadd.xlane.f32.xlu1 %v301_v50  ;;  %299 = vadd.xlane.f32.xlu0 %v298_v51 }
  0x44   : > { %334 = vadd.xlane.f32.xlu1 %v333_v54  ;;  %331 = vadd.xlane.f32.xlu0 %v330_v55 }
  0x48   : > { %308 = vadd.xlane.f32.xlu1 %v307_v58  ;;  %305 = vadd.xlane.f32.xlu0 %v304_v59 }
  0x4c   : > { %340 = vadd.xlane.f32.xlu1 %v339_v62  ;;  %337 = vadd.xlane.f32.xlu0 %v336_v63 }
  0x99   : > { %v248_v10 = vpop.xlane.xlu1 %247  ;;  %v224_v11 = vpop.xlane.xlu0 %223 }
  0x9a   : > { %v270_v20 = vadd.f32 %v248_v10, %v224_v11 }
  0x9c   : > { %v350_v24 = vmul.f32 0.0625, %v270_v20 }
  0x9d   : > { %v251_v14 = vpop.xlane.xlu1 %250  ;;  %v227_v15 = vpop.xlane.xlu0 %226 }
  0x9e   : > { %v271_v21 = vadd.f32 %v251_v14, %v227_v15  ;;  %v366_v31 = vmul.f32 %v350_v24, %v350_v24 }
  0xa0   : > { %v351_v25 = vmul.f32 0.0625, %v271_v21 }
  0xa1   : > { %v233_v16 = vpop.xlane.xlu1 %232  ;;  %v230_v17 = vpop.xlane.xlu0 %229 }
  0xa2   : > { %v367_v38 = vmul.f32 %v351_v25, %v351_v25 }
  0xa5   : > { %v257_v18 = vpop.xlane.xlu1 %256  ;;  %v254_v19 = vpop.xlane.xlu0 %253 }
  0xa6   : > { %v273_v30 = vadd.f32 %v257_v18, %v233_v16  ;;  %v272_v34 = vadd.f32 %v254_v19, %v230_v17  ;;  %v427_v18 = vsub.f32 %v822_v2, %v351_v25  ;;  %v407_v19 = vsub.f32 %v829_v5, %v351_v25 }
  0xa8   : > { %v949_v48 = vmul.f32 0.0625, %v273_v30  ;;  %v951_v49 = vmul.f32 0.0625, %v272_v34 }
  0xa9   : > { %v291_v22 = vpop.xlane.xlu1 %290  ;;  %v288_v23 = vpop.xlane.xlu0 %287 }
  0xaa   : > { %v369_v58 = vmul.f32 %v949_v48, %v949_v48  ;;  %v368_v60 = vmul.f32 %v951_v49, %v951_v49  ;;  %v408_v25 = vsub.f32 %v839_v9, %v951_v49 }
  0xad   : > { %v323_v26 = vpop.xlane.xlu1 %322  ;;  %v320_v27 = vpop.xlane.xlu0 %319 }
  0xae   : > { %v343_v28 = vadd.f32 %v323_v26, %v291_v22  ;;  %v342_v29 = vadd.f32 %v320_v27, %v288_v23  ;;  %v426_v23 = vsub.f32 %v816_v0, %v350_v24  ;;  %v406_v26 = vsub.f32 %v819_v1, %v350_v24 }
  0xaf   : > { %v409_v0 = vsub.f32 %v836_v8, %v949_v48  ;;  %v429_v1 = vsub.f32 %v846_v12, %v949_v48 }
  0xb0   : > { %v359_v35 = vmul.f32 0.0625, %v343_v28  ;;  %v358_v39 = vmul.f32 0.0625, %v342_v29 }
  0xb1   : > { %v297_v42 = vpop.xlane.xlu1 %296  ;;  %v294_v43 = vpop.xlane.xlu0 %293 }
  0xb2   : > { %v375_v46 = vsub.f32 %v359_v35, %v367_v38  ;;  %v374_v47 = vsub.f32 %v358_v39, %v366_v31 }
  0xb4   : > { %v383_v50 = vmax.f32 %v375_v46, 0.0  ;;  %v382_v51 = vmax.f32 %v374_v47, 0.0  ;;  %v428_v46 = vsub.f32 %v849_v13, %v951_v49 }
  0xb5   : > { %v329_v52 = vpop.xlane.xlu1 %328  ;;  %v326_v53 = vpop.xlane.xlu0 %325 }
  0xb6   : > { %v391_v54 = vadd.f32 1e-05, %v383_v50  ;;  %v390_v55 = vadd.f32 1e-05, %v382_v51  ;;  %v345_v56 = vadd.f32 %v329_v52, %v297_v42  ;;  %v344_v57 = vadd.f32 %v326_v53, %v294_v43 }
  0xb8   : > { %750 = vrsqrt.f32 %v391_v54  ;;  %v361_v59 = vmul.f32 0.0625, %v345_v56  ;;  %v360_v61 = vmul.f32 0.0625, %v344_v57 }
  0xb9   : > { %752 = vrsqrt.f32 %v390_v55  ;;  %v239_v62 = vpop.xlane.xlu1 %238  ;;  %v236_v63 = vpop.xlane.xlu0 %235 }
  0xba   : > { %v377_v3 = vsub.f32 %v361_v59, %v369_v58  ;;  %v376_v4 = vsub.f32 %v360_v61, %v368_v60 }
  0xbc   : > { %v385_v6 = vmax.f32 %v377_v3, 0.0  ;;  %v384_v7 = vmax.f32 %v376_v4, 0.0 }
  0xbd   : > { %v263_v10 = vpop.xlane.xlu1 %262  ;;  %v260_v11 = vpop.xlane.xlu0 %259 }
  0xbe   : > { %v393_v14 = vadd.f32 1e-05, %v385_v6  ;;  %v392_v15 = vadd.f32 1e-05, %v384_v7  ;;  %v275_v30 = vadd.f32 %v263_v10, %v239_v62  ;;  %v274_v35 = vadd.f32 %v260_v11, %v236_v63 }
  0xc0   : > { %754 = vrsqrt.f32 %v393_v14  ;;  %v961_v43 = vmul.f32 0.0625, %v275_v30  ;;  %v354_v5 = vmul.f32 0.0625, %v274_v35 }
  0xc1   : > { %756 = vrsqrt.f32 %v392_v15  ;;  %v245_v16 = vpop.xlane.xlu1 %244  ;;  %v242_v17 = vpop.xlane.xlu0 %241 }
  0xc2   : > { %v371_v8 = vmul.f32 %v961_v43, %v961_v43  ;;  %v370_v59 = vmul.f32 %v354_v5, %v354_v5  ;;  %v411_v30 = vsub.f32 %v880_v32, %v961_v43  ;;  %v410_v35 = vsub.f32 %v883_v33, %v354_v5 }
  0xc5   : > { %v751_v20 = vpop.eup %750  ;;  %v269_v21 = vpop.xlane.xlu1 %268 }
  0xc6   : > { %v266_v22 = vpop.xlane.xlu0 %265  ;;  %v753_v27 = vpop.eup %752  ;;  %v435_v28 = vmul.f32 %v751_v20, %v427_v18  ;;  %v415_v29 = vmul.f32 %v751_v20, %v407_v19  ;;  %v277_v56 = vadd.f32 %v269_v21, %v245_v16 }
  0xc7   : > { %v434_v31 = vmul.f32 %v753_v27, %v426_v23  ;;  %v414_v34 = vmul.f32 %v753_v27, %v406_v26  ;;  %v276_v57 = vadd.f32 %v266_v22, %v242_v17 }
  0xc8   : > { %v357_v3 = vmul.f32 0.0625, %v277_v56 }
  0xc9   : > { %v303_v38 = vpop.xlane.xlu1 %302  ;;  %v442_v42 = vpack.c.bf16 %v435_v28, %v434_v31  ;;  %v422_v2 = vpack.c.bf16 %v415_v29, %v414_v34  ;;  %v356_v4 = vmul.f32 0.0625, %v276_v57  ;;  %v431_v31 = vsub.f32 %v890_v36, %v961_v43 }
  0xca   : > { %v300_v39 = vpop.xlane.xlu0 %299  ;;  %v373_v18 = vmul.f32 %v357_v3, %v357_v3  ;;  %v413_v32 = vsub.f32 %v900_v40, %v357_v3  ;;  %v433_v36 = vsub.f32 %v910_v44, %v357_v3 }
  0xcb   : > { %722 = vmatprep.mubr.msk.bf16.mxu0 %vm221_vm0, %v442_v42  ;;  %732 = vmatprep.mubr.msk.bf16.mxu1 %vm221_vm0, %v422_v2  ;;  %v372_v20 = vmul.f32 %v356_v4, %v356_v4  ;;  %v412_v33 = vsub.f32 %v903_v41, %v356_v4  ;;  %v706_v41 = vld [vmem:[%s1022_s3] ss:$0 sm:$0xff] }
  0xcd   : > { %v755_v24 = vpop.eup %754  ;;  %v335_v47 = vpop.xlane.xlu1 %334 }
  0xce   : > { %v332_v50 = vpop.xlane.xlu0 %331  ;;  %v757_v51 = vpop.eup %756  ;;  %v347_v52 = vadd.f32 %v335_v47, %v303_v38  ;;  %v437_v54 = vmul.f32 %v755_v24, %v429_v1  ;;  %v417_v55 = vmul.f32 %v755_v24, %v409_v0  ;;  %v430_v38 = vsub.f32 %v893_v37, %v354_v5 }
  0xcf   : > { %v346_v53 = vadd.f32 %v332_v50, %v300_v39  ;;  %v436_v12 = vmul.f32 %v757_v51, %v428_v46  ;;  %v416_v48 = vmul.f32 %v757_v51, %v408_v25  ;;  %v432_v37 = vsub.f32 %v913_v45, %v356_v4 }
  0xd0   : > { %v363_v58 = vmul.f32 0.0625, %v347_v52 }
  0xd1   : > { %v362_v9 = vmul.f32 0.0625, %v346_v53  ;;  %v309_v60 = vpop.xlane.xlu1 %308  ;;  %v443_v13 = vpack.c.bf16 %v437_v54, %v436_v12  ;;  %v423_v49 = vpack.c.bf16 %v417_v55, %v416_v48 }
  0xd2   : > { %v306_v61 = vpop.xlane.xlu0 %305  ;;  %v379_v62 = vsub.f32 %v363_v58, %v371_v8 }
  0xd3   : > { %v378_v63 = vsub.f32 %v362_v9, %v370_v59  ;;  %723 = vmatmul.mubr.msk.bf16.vlgmr.msra.gmra.mxu0 %vm221_vm0, %v443_v13  ;;  %733 = vmatmul.mubr.msk.bf16.vlgmr.msra.gmra.mxu1 %vm221_vm0, %v423_v49 }
  0xd4   : > { %v387_v6 = vmax.f32 %v379_v62, 0.0 }
  0xd5   : > { %v386_v7 = vmax.f32 %v378_v63, 0.0  ;;  %v341_v10 = vpop.xlane.xlu1 %340 }
  0xd6   : > { %v338_v11 = vpop.xlane.xlu0 %337  ;;  %v395_v14 = vadd.f32 1e-05, %v387_v6  ;;  %v349_v16 = vadd.f32 %v341_v10, %v309_v60 }
  0xd7   : > { %v394_v15 = vadd.f32 1e-05, %v386_v7  ;;  %v348_v17 = vadd.f32 %v338_v11, %v306_v61 }
  0xd8   : > { %758 = vrsqrt.f32 %v395_v14  ;;  %v365_v19 = vmul.f32 0.0625, %v349_v16 }
  0xd9   : > { %v364_v21 = vmul.f32 0.0625, %v348_v17  ;;  %760 = vrsqrt.f32 %v394_v15 }
  0xda   : > { %v381_v22 = vsub.f32 %v365_v19, %v373_v18 }
  0xdb   : > { %v380_v23 = vsub.f32 %v364_v21, %v372_v20 }
  0xdc   : > { %v389_v26 = vmax.f32 %v381_v22, 0.0 }
  0xdd   : > { %v388_v27 = vmax.f32 %v380_v23, 0.0 }
  0xde   : > { %v397_v28 = vadd.f32 1e-05, %v389_v26 }
  0xdf   : > { %v396_v29 = vadd.f32 1e-05, %v388_v27 }
  0xe0   : > { %762 = vrsqrt.f32 %v397_v28 }
  0xe1   : > { %764 = vrsqrt.f32 %v396_v29 }
  0xe5   : > { %v759_v34 = vpop.eup %758 }
  0xe6   : > { %v761_v39 = vpop.eup %760  ;;  %v439_v42 = vmul.f32 %v759_v34, %v431_v31  ;;  %v419_v2 = vmul.f32 %v759_v34, %v411_v30 }
  0xe7   : > { %v438_v0 = vmul.f32 %v761_v39, %v430_v38  ;;  %v418_v1 = vmul.f32 %v761_v39, %v410_v35 }
  0xe9   : > { %v444_v24 = vpack.c.bf16 %v439_v42, %v438_v0  ;;  %v424_v25 = vpack.c.bf16 %v419_v2, %v418_v1 }
  0xeb   : > { %726 = vmatprep.mubr.msk.bf16.mxu0 %vm221_vm0, %v444_v24  ;;  %736 = vmatprep.mubr.msk.bf16.mxu1 %vm221_vm0, %v424_v25 }
  0xed   : > { %v763_v43 = vpop.eup %762 }
  0xee   : > { %v765_v5 = vpop.eup %764  ;;  %v441_v46 = vmul.f32 %v763_v43, %v433_v36  ;;  %v421_v47 = vmul.f32 %v763_v43, %v413_v32 }
  0xef   : > { %v440_v50 = vmul.f32 %v765_v5, %v432_v37  ;;  %v420_v51 = vmul.f32 %v765_v5, %v412_v33 }
  0xf1   : > { %v445_v52 = vpack.c.bf16 %v441_v46, %v440_v50  ;;  %v425_v53 = vpack.c.bf16 %v421_v47, %v420_v51 }
  0xf3   : > { %727 = vmatmul.mubr.msk.bf16.gmra.mxu0 %vm221_vm0, %v445_v52  ;;  %737 = vmatmul.mubr.msk.bf16.gmra.mxu1 %vm221_vm0, %v425_v53 }
 0x193   : > { %v724_v40 = vpop.f32.mrf.mxu0  ;;  %v734_v54 = vpop.f32.mrf.mxu1 }
 0x194   : > { %v587_v44 = vadd.f32 %v734_v54, %v724_v40 }
 0x195   : > { %v498_v45 = vpop.f32.mrf.mxu0  ;;  %v578_v55 = vpop.f32.mrf.mxu1 }
 0x196   : > { %v618_v56 = vadd.f32 %v706_v41, %v587_v44  ;;  %v579_v8 = vadd.f32 %v578_v55, %v498_v45 }
 0x197   : > { %v725_v12 = vpop.f32.mrf.mxu0  ;;  %v735_v48 = vpop.f32.mrf.mxu1 }
 0x198   : > { %626 = vst.msk [vmem:[%s998_s5 + $0x10] sm:$0xff] %vm221_vm0, %v618_v56  ;;  %v616_v57 = vadd.f32 %v706_v41, %v579_v8  ;;  %v590_v58 = vadd.f32 %v735_v48, %v725_v12 }
 0x199   : > { %v501_v59 = vpop.f32.mrf.mxu0  ;;  %v581_v9 = vpop.f32.mrf.mxu1 }
 0x19a   : > { %624 = vst.msk [vmem:[%s998_s5] sm:$0xff] %vm221_vm0, %v616_v57  ;;  %v619_v60 = vadd.f32 %v706_v41, %v590_v58  ;;  %v582_v61 = vadd.f32 %v581_v9, %v501_v59 }
 0x19c   : > { %627 = vst.msk [vmem:[%s998_s5 + $0x18] sm:$0xff] %vm221_vm0, %v619_v60  ;;  %v617_v13 = vadd.f32 %v706_v41, %v582_v61 }
 0x19e   : > { %625 = vst.msk [vmem:[%s998_s5 + $0x8] sm:$0xff] %vm221_vm0, %v617_v13 }
 0x1b3   : > { %v728_v49 = vpop.f32.mrf.mxu0  ;;  %v738_v62 = vpop.f32.mrf.mxu1 }
 0x1b4   : > { %v603_v63 = vadd.f32 %v738_v62, %v728_v49 }
 0x1b5   : > { %v514_v3 = vpop.f32.mrf.mxu0  ;;  %v594_v4 = vpop.f32.mrf.mxu1 }
 0x1b6   : > { %v622_v6 = vadd.f32 %v706_v41, %v603_v63  ;;  %v595_v7 = vadd.f32 %v594_v4, %v514_v3 }
 0x1b7   : > { %v729_v10 = vpop.f32.mrf.mxu0  ;;  %v739_v11 = vpop.f32.mrf.mxu1 }
 0x1b8   : > { %630 = vst.msk [vmem:[%s998_s5 + $0x30] sm:$0xff] %vm221_vm0, %v622_v6  ;;  %v620_v14 = vadd.f32 %v706_v41, %v595_v7  ;;  %v606_v15 = vadd.f32 %v739_v11, %v729_v10 }
 0x1b9   : > { %v517_v16 = vpop.f32.mrf.mxu0  ;;  %v597_v17 = vpop.f32.mrf.mxu1 }
 0x1ba   : > { %628 = vst.msk [vmem:[%s998_s5 + $0x20] sm:$0xff] %vm221_vm0, %v620_v14  ;;  %v623_v18 = vadd.f32 %v706_v41, %v606_v15  ;;  %v598_v19 = vadd.f32 %v597_v17, %v517_v16 }
 0x1bc   : > { %631 = vst.msk [vmem:[%s998_s5 + $0x38] sm:$0xff] %vm221_vm0, %v623_v18  ;;  %v621_v20 = vadd.f32 %v706_v41, %v598_v19 }
 0x1be   : > { %629 = vst.msk [vmem:[%s998_s5 + $0x28] sm:$0xff] %vm221_vm0, %v621_v20 }
 0x1bf PF: > { %s14_s15 = sadd.s32 1, %s772_s15  }
 0x1c0   : > { %p11_p4 = scmp.ge.s32.totalorder %s14_s15, 4  }
 0x1c2   :  { %13 = sbr.rel (!%p11_p4) target bundleno = 1 (0x1), region = 66 }

</bundles_post_ra>
